<compile_context>
chip_gen: v7x
topology: tpu7x:2x2x1
jax: 0.10.0
libtpu: 0.0.40
codegen_flags: <defaults>
</compile_context>

<pallas_src>
import jax
import jax.numpy as jnp
from jax.experimental import pallas as pl
from jax.experimental.pallas import tpu as pltpu


def _make_kernel(hw, bt):
    """Kernel closure for a given spatial size and batch tile."""
    inv_hw = 1.0 / float(hw)

    def kernel(x_ref, w1t_ref, b1_ref, w2t_ref, b2_ref, o_ref):
        # x_ref: (Bt, C, HW) native dtype
        # w1t:   (C, Ch)   b1: (1, Ch)   w2t: (Ch, C)   b2: (1, C)
        x = x_ref[...]

        # Adaptive avg/max pool to 1x1 == reductions over the spatial (lane)
        # axis.  Input is unpadded, so no masking is needed; only the tiny
        # (Bt, C) pooled vectors are kept in f32.
        avg_p = jnp.sum(x, axis=-1, dtype=jnp.float32) * inv_hw   # (Bt, C) f32
        max_p = jnp.max(x, axis=-1).astype(jnp.float32)           # (Bt, C) f32

        # Fused MLP: one (2*Bt, C) RHS instead of 2*Bt separate N=1 matmuls.
        p = jnp.concatenate([avg_p, max_p], axis=0)               # (2*Bt, C)
        h = jnp.dot(p, w1t_ref[...], preferred_element_type=jnp.float32)
        h = jnp.maximum(h + b1_ref[...], 0.0)                     # (2*Bt, Ch)
        o = jnp.dot(h, w2t_ref[...], preferred_element_type=jnp.float32)
        o = o + b2_ref[...]                                       # (2*Bt, C)

        attn = jax.nn.sigmoid(o[:bt] + o[bt:])                    # (Bt, C) f32

        # Re-read the tile (already resident in VMEM) so its live range does
        # not span the MLP; multiply in the output dtype.
        o_ref[...] = (x_ref[...] * attn[:, :, None].astype(o_ref.dtype)
                      ).astype(o_ref.dtype)

    return kernel


def _vmem_capacity_bytes():
    try:
        info = pltpu.get_tpu_info()
        cap = getattr(info, "vmem_capacity_bytes", None)
        if cap:
            return int(cap)
    except Exception:
        pass
    return 128 << 20  # v5e / v6e default


def _pick_bt(batch, slab_bytes, target_block_bytes):
    """Largest divisor of `batch` whose block fits the byte target, preferring
    an even number of grid steps (balanced v7x megacore split), then >= 2
    steps, then the largest block that fits."""
    divisors = [d for d in range(1, batch + 1) if batch % d == 0]
    fitting = [d for d in divisors if d * slab_bytes <= target_block_bytes]
    if not fitting:
        fitting = [1]
    even_steps = [d for d in fitting if (batch // d) % 2 == 0]
    if even_steps:
        return max(even_steps)
    multi_steps = [d for d in fitting if batch // d >= 2]
    if multi_steps:
        return max(multi_steps)
    return max(fitting)


def channel_attention(x_nchw, w1, b1, w2, b2, *, target_block_bytes=None):
    """x_nchw: (B, C, H, W). w1: (Ch, C), b1: (Ch,), w2: (C, Ch), b2: (C,)."""
    B, C, H, W = x_nchw.shape
    Ch = w1.shape[0]
    HW = H * W

    x_flat = x_nchw.reshape(B, C, HW)          # no pad: full-extent last dims
    itemsize = jnp.dtype(x_flat.dtype).itemsize
    slab_bytes = C * HW * itemsize

    vmem_cap = _vmem_capacity_bytes()
    vmem_budget = int(vmem_cap * 0.75)
    if target_block_bytes is None:
        # Smaller blocks on 64 MiB VMEM parts (v7x), larger on 128 MiB parts.
        target_block_bytes = (6 << 20) if vmem_cap <= (64 << 20) else (12 << 20)

    bt = _pick_bt(B, slab_bytes, target_block_bytes)
    block_bytes = bt * slab_bytes
    weight_bytes = (2 * C * Ch + C + Ch) * 4

    # VMEM accounting: double-buffered input + output blocks, one tile-sized
    # temporary for the attn-scaled product, weights, and slack.
    vmem_need = 5 * block_bytes + 2 * weight_bytes + (2 << 20)
    if vmem_need > vmem_budget:
        # TODO(synk): add an HW-chunked two-pass variant (manual DMA with
        # pl.ANY) for slabs too large to fit the per-step VMEM budget.
        raise ValueError(
            f"ChannelAttention block of {block_bytes} bytes (B={B}, C={C}, "
            f"HW={HW}) exceeds the VMEM budget of {vmem_budget} bytes.")
    vmem_limit = int(min(max(vmem_need, 32 << 20), vmem_budget))

    # Pre-transposed weights / row biases so no in-kernel transposes are needed.
    w1_t = w1.T                     # (C, Ch)
    w2_t = w2.T                     # (Ch, C)
    b1_row = b1.reshape(1, Ch)
    b2_row = b2.reshape(1, C)

    kernel = _make_kernel(HW, bt)

    cost = pl.CostEstimate(
        flops=B * (8 * C * Ch + 3 * C * HW),
        transcendentals=B * C,                                   # sigmoid
        bytes_accessed=2 * B * C * HW * itemsize + 2 * weight_bytes,
    )

    out_flat = pl.pallas_call(
        kernel,
        out_shape=jax.ShapeDtypeStruct((B, C, HW), x_flat.dtype),
        grid_spec=pltpu.PrefetchScalarGridSpec(
            num_scalar_prefetch=0,
            grid=(B // bt,),
            in_specs=[
                pl.BlockSpec((bt, C, HW), lambda i: (i, 0, 0)),
                pl.BlockSpec((C, Ch), lambda i: (0, 0)),
                pl.BlockSpec((1, Ch), lambda i: (0, 0)),
                pl.BlockSpec((Ch, C), lambda i: (0, 0)),
                pl.BlockSpec((1, C), lambda i: (0, 0)),
            ],
            out_specs=pl.BlockSpec((bt, C, HW), lambda i: (i, 0, 0)),
        ),
        compiler_params=pltpu.CompilerParams(
            dimension_semantics=("parallel",),
            vmem_limit_bytes=vmem_limit,
        ),
        cost_estimate=cost,
    )(x_flat, w1_t, b1_row, w2_t, b2_row)

    return out_flat.reshape(B, C, H, W)


def channel_attention_ref(x, w1, b1, w2, b2):
    # Pure-JAX reference mirroring the PyTorch forward.
    avg_p = jnp.mean(x, axis=(2, 3))          # (B, C)
    max_p = jnp.max(x, axis=(2, 3))           # (B, C)

    def mlp(p):  # p: (B, C)
        h = jnp.maximum(p @ w1.T + b1, 0.0)   # (B, Ch)
        return h @ w2.T + b2                  # (B, C)

    attn = jax.nn.sigmoid(mlp(avg_p) + mlp(max_p))   # (B, C)
    return x * attn[:, :, None, None]


def _run_case(key, B, C, H, W):
    Ch = C // 16
    kx, k1, kb1, k2, kb2 = jax.random.split(key, 5)
    x = jax.random.normal(kx, (B, C, H, W), dtype=jnp.float32)
    # Conv2d(C, Ch, 1) weight (Ch, C, 1, 1) -> (Ch, C); bias (Ch,)
    w1 = jax.random.normal(k1, (Ch, C), dtype=jnp.float32) * 0.1
    b1 = jax.random.normal(kb1, (Ch,), dtype=jnp.float32) * 0.1
    # Conv2d(Ch, C, 1) weight (C, Ch, 1, 1) -> (C, Ch); bias (C,)
    w2 = jax.random.normal(k2, (C, Ch), dtype=jnp.float32) * 0.1
    b2 = jax.random.normal(kb2, (C,), dtype=jnp.float32) * 0.1

    out = jax.block_until_ready(channel_attention(x, w1, b1, w2, b2))
    ref = channel_attention_ref(x, w1, b1, w2, b2)
    assert out.shape == (B, C, H, W)
    assert jnp.allclose(out, ref, atol=1e-5, rtol=1e-5), "mismatch vs reference"


if __name__ == "__main__":
    key = jax.random.PRNGKey(0)
    k1, k2 = jax.random.split(key)

    # Main case: channels >= 16 so channels // 16 >= 1; HW a multiple of 128
    # (naturally lane-dense stores).
    _run_case(k1, B=2, C=64, H=16, W=16)
    # Odd spatial size exercises the unpadded / masked-store path (HW=63).
    _run_case(k2, B=2, C=32, H=7, W=9)

    print("KERNEL_OK")
</pallas_src>

<mosaic_0001>
module attributes {stable_mosaic.version = 11 : i64} {
  func.func @kernel(%arg0: i32, %arg1: memref<1x64x256xf32, #tpu.memory_space<vmem>>, %arg2: memref<64x4xf32, #tpu.memory_space<vmem>>, %arg3: memref<1x4xf32, #tpu.memory_space<vmem>>, %arg4: memref<4x64xf32, #tpu.memory_space<vmem>>, %arg5: memref<1x64xf32, #tpu.memory_space<vmem>>, %arg6: memref<1x64x256xf32, #tpu.memory_space<vmem>>) attributes {dimension_semantics = [#tpu.dimension_semantics<parallel>], iteration_bounds = array<i64: 2>, scalar_prefetch = 0 : i64, scratch_operands = 0 : i64, tpu.core_type = #tpu.core_type<tc>, window_params = [{transform_indices = @transform_0, window_bounds = array<i64: 1, 64, 256>}, {pipeline_mode = #tpu.pipeline_mode<synchronous>, transform_indices = @transform_1, window_bounds = array<i64: 64, 4>}, {pipeline_mode = #tpu.pipeline_mode<synchronous>, transform_indices = @transform_2, window_bounds = array<i64: 1, 4>}, {pipeline_mode = #tpu.pipeline_mode<synchronous>, transform_indices = @transform_3, window_bounds = array<i64: 4, 64>}, {pipeline_mode = #tpu.pipeline_mode<synchronous>, transform_indices = @transform_4, window_bounds = array<i64: 1, 64>}, {transform_indices = @transform_5, window_bounds = array<i64: 1, 64, 256>}]} {
    %c0 = arith.constant 0 : index
    %c0_0 = arith.constant 0 : index
    %c0_1 = arith.constant 0 : index
    %0 = vector.load %arg1[%c0, %c0_0, %c0_1] : memref<1x64x256xf32, #tpu.memory_space<vmem>>, vector<1x64x256xf32>
    %cst = arith.constant dense<0.000000e+00> : vector<1x64xf32>
    %1 = vector.multi_reduction <add>, %0, %cst [2] : vector<1x64x256xf32> to vector<1x64xf32>
    %cst_2 = arith.constant 3.906250e-03 : f32
    %2 = vector.broadcast %cst_2 : f32 to vector<1x64xf32>
    %3 = arith.mulf %1, %2 : vector<1x64xf32>
    %cst_3 = arith.constant dense<0xFF800000> : vector<1x64xf32>
    %4 = vector.multi_reduction <maximumf>, %0, %cst_3 [2] : vector<1x64x256xf32> to vector<1x64xf32>
    %5 = tpu.concatenate %3, %4 in 0 : vector<1x64xf32>, vector<1x64xf32> -> vector<2x64xf32>
    %c0_4 = arith.constant 0 : index
    %c0_5 = arith.constant 0 : index
    %6 = vector.load %arg2[%c0_4, %c0_5] : memref<64x4xf32, #tpu.memory_space<vmem>>, vector<64x4xf32>
    %cst_6 = arith.constant dense<0.000000e+00> : vector<2x4xf32>
    %7 = tpu.matmul %5, %6, %cst_6 {dimension_numbers = #tpu.dot_dimension_numbers<[1], [0], [0], [1], [0, 0, 1, 1], [], []>} : vector<2x64xf32>, vector<64x4xf32>, vector<2x4xf32> -> vector<2x4xf32>
    %c0_7 = arith.constant 0 : index
    %c0_8 = arith.constant 0 : index
    %8 = vector.load %arg3[%c0_7, %c0_8] : memref<1x4xf32, #tpu.memory_space<vmem>>, vector<1x4xf32>
    %9 = vector.broadcast %8 : vector<1x4xf32> to vector<2x4xf32>
    %10 = arith.addf %7, %9 : vector<2x4xf32>
    %cst_9 = arith.constant 0.000000e+00 : f32
    %11 = vector.broadcast %cst_9 : f32 to vector<2x4xf32>
    %12 = arith.maximumf %10, %11 : vector<2x4xf32>
    %c0_10 = arith.constant 0 : index
    %c0_11 = arith.constant 0 : index
    %13 = vector.load %arg4[%c0_10, %c0_11] : memref<4x64xf32, #tpu.memory_space<vmem>>, vector<4x64xf32>
    %cst_12 = arith.constant dense<0.000000e+00> : vector<2x64xf32>
    %14 = tpu.matmul %12, %13, %cst_12 {dimension_numbers = #tpu.dot_dimension_numbers<[1], [0], [0], [1], [0, 0, 1, 1], [], []>} : vector<2x4xf32>, vector<4x64xf32>, vector<2x64xf32> -> vector<2x64xf32>
    %c0_13 = arith.constant 0 : index
    %c0_14 = arith.constant 0 : index
    %15 = vector.load %arg5[%c0_13, %c0_14] : memref<1x64xf32, #tpu.memory_space<vmem>>, vector<1x64xf32>
    %16 = vector.broadcast %15 : vector<1x64xf32> to vector<2x64xf32>
    %17 = arith.addf %14, %16 : vector<2x64xf32>
    %18 = vector.extract_strided_slice %17 {offsets = [0, 0], sizes = [1, 64], strides = [1, 1]} : vector<2x64xf32> to vector<1x64xf32>
    %19 = vector.extract_strided_slice %17 {offsets = [1, 0], sizes = [1, 64], strides = [1, 1]} : vector<2x64xf32> to vector<1x64xf32>
    %20 = arith.addf %18, %19 : vector<1x64xf32>
    %21 = arith.negf %20 : vector<1x64xf32>
    %22 = math.exp %21 : vector<1x64xf32>
    %cst_15 = arith.constant 1.000000e+00 : f32
    %23 = vector.broadcast %cst_15 : f32 to vector<1x64xf32>
    %24 = arith.addf %23, %22 : vector<1x64xf32>
    %25 = arith.divf %23, %24 : vector<1x64xf32>
    %c0_16 = arith.constant 0 : index
    %c0_17 = arith.constant 0 : index
    %c0_18 = arith.constant 0 : index
    %26 = vector.load %arg1[%c0_16, %c0_17, %c0_18] : memref<1x64x256xf32, #tpu.memory_space<vmem>>, vector<1x64x256xf32>
    %27 = vector.shape_cast %25 : vector<1x64xf32> to vector<1x64x1xf32>
    %28 = vector.broadcast %27 : vector<1x64x1xf32> to vector<1x64x256xf32>
    %29 = arith.mulf %26, %28 : vector<1x64x256xf32>
    %c0_19 = arith.constant 0 : index
    %c0_20 = arith.constant 0 : index
    %c0_21 = arith.constant 0 : index
    %30 = vector.load %arg6[%c0_19, %c0_20, %c0_21] : memref<1x64x256xf32, #tpu.memory_space<vmem>>, vector<1x64x256xf32>
    tpu.vector_store %arg6[%c0_19, %c0_20, %c0_21], %29 {strides = array<i32>} : memref<1x64x256xf32, #tpu.memory_space<vmem>>, vector<1x64x256xf32>,
    return
  }
  func.func @transform_0(%arg0: i32) -> (i32, i32, i32) {
    %c0_i32 = arith.constant 0 : i32
    %c0_i32_0 = arith.constant 0 : i32
    %c0_i32_1 = arith.constant 0 : i32
    return %arg0, %c0_i32, %c0_i32_0 : i32, i32, i32
  }
  func.func @transform_1(%arg0: i32) -> (i32, i32) {
    %c0_i32 = arith.constant 0 : i32
    %c0_i32_0 = arith.constant 0 : i32
    %c0_i32_1 = arith.constant 0 : i32
    return %c0_i32, %c0_i32_0 : i32, i32
  }
  func.func @transform_2(%arg0: i32) -> (i32, i32) {
    %c0_i32 = arith.constant 0 : i32
    %c0_i32_0 = arith.constant 0 : i32
    %c0_i32_1 = arith.constant 0 : i32
    return %c0_i32, %c0_i32_0 : i32, i32
  }
  func.func @transform_3(%arg0: i32) -> (i32, i32) {
    %c0_i32 = arith.constant 0 : i32
    %c0_i32_0 = arith.constant 0 : i32
    %c0_i32_1 = arith.constant 0 : i32
    return %c0_i32, %c0_i32_0 : i32, i32
  }
  func.func @transform_4(%arg0: i32) -> (i32, i32) {
    %c0_i32 = arith.constant 0 : i32
    %c0_i32_0 = arith.constant 0 : i32
    %c0_i32_1 = arith.constant 0 : i32
    return %c0_i32, %c0_i32_0 : i32, i32
  }
  func.func @transform_5(%arg0: i32) -> (i32, i32, i32) {
    %c0_i32 = arith.constant 0 : i32
    %c0_i32_0 = arith.constant 0 : i32
    %c0_i32_1 = arith.constant 0 : i32
    return %arg0, %c0_i32, %c0_i32_0 : i32, i32, i32
  }
}

</mosaic_0001>

<bundles_post_ra>
// kernel: tpu_custom_call.1
= control target key start
LH: loop header
LB: loop body
LE: loop exit
PB: predicated region body
PF: predicated region fallthrough
CT: control target
= control target key end

     0   :  { %10 = vsyncpa [#allocation3], 0  ;;  %s1367_s0 = inlined_call_operand.hbm [shape: f32[2,64,256], index: 0, kind: input, shape index: {}]   ;;  %s1368_s1 = inlined_call_operand.vmem [shape: f32[64,4], index: 1, kind: input, shape index: {}]   ;;  %s1369_s2 = inlined_call_operand.vmem [shape: f32[1,4], index: 2, kind: input, shape index: {}]   ;;  %s1370_s3 = inlined_call_operand.vmem [shape: f32[4,64], index: 3, kind: input, shape index: {}]   ;;  %s1371_s4 = inlined_call_operand.vmem [shape: f32[1,64], index: 4, kind: input, shape index: {}]   ;;  %s1372_s5 = inlined_call_operand.hbm [shape: f32[2,64,256], index: 5, kind: output, shape index: {}]  }
   0x1   :  { %12 = vsyncpa [#allocation3 + $0x1], 0 }
   0x2   :  { %13 = vsyncpa [#allocation4], 0 }
   0x3   :  { %15 = vsyncpa [#allocation4 + $0x1], 0  ;;  %s1032_s18 = smov 0   ;;  %s1034_s19 = smov 0  }
   0x4   :  { %s1036_s20 = smov 0   ;;  %s1038_s21 = smov 0  }
   0x5 LB: > { %s1053_s22 = sadd.s32 4294967295, %s991_s21   ;;  %s769_s23 = sadd.s32 4294967294, %s991_s21   ;;  %s991_s21 = sphi %s1038_s21, %s1385_s21   ;;  %s987_s20 = sphi %s1036_s20, %s1384_s20   ;;  %s983_s19 = sphi %s1034_s19, %s1383_s19   ;;  %s979_s18 = sphi %s1032_s18, %s1382_s18  }
   0x6   : > { %s1057_s24 = sadd.s32 1, %s991_s21   ;;  %s28_s25 = sadd.s32 1, %s987_s20 }
   0x7   : > { %s25_s26 = ssub.s32 %s991_s21, %s1057_s24  ;;  %p35_p0 = scmp.ne.s32.totalorder %s987_s20, %s983_s19 }
   0x8   : > { %p26_p1 = scmp.eq.s32.totalorder %s25_s26, 0  ;;  %p36_p2 = scmp.eq.s32.totalorder %s991_s21, 0 }
   0x9   : > { %p41_p3 = scmp.ne.s32.totalorder %s983_s19, %s979_s18  ;;  %p42_p4 = scmp.eq.s32.totalorder %s1053_s22, 0 }
   0xa   : > { %s1069_s27 = scalar_select %p26_p1, %s987_s20, %s28_s25  }
   0xb   : > { %p1071_p5 = por %p36_p2, %p35_p0  ;;  %p1075_p6 = por %p42_p4, %p41_p3 }
   0xc   : > { %p149_p7 = scmp.eq.s32.totalorder %s1053_s22, 1  ;;  %p155_p8 = scmp.eq.s32.totalorder %s769_s23, 1 }
   0xd   : > { %p850_p10 = scmp.lt.s32.totalorder %s991_s21, 2  ;;  %s187_s7 = sand.u32 1, %s987_s20  }
   0xe   : > { %p1082_p11 = por %p149_p7, %p35_p0  ;;  %p1086_p12 = por %p155_p8, %p41_p3 }
   0xf   : > { %s789_s8 = sshll.u32 %s991_s21, 11  ;;  %s772_s9 = sshll.u32 %s187_s7, 7 }
  0x10   : > { %s1376_s30 = scalar_select %p1082_p11, 1, 0 }
  0x11   : > { %s1377_s6 = scalar_select %p1086_p12, 1, 0 }
  0x12   : > { %s1095_s12 = scalar_lea.hbm %s1367_s0, %s789_s8  ;;  %s191_s13 = scalar_lea.vmem [#allocation2], %s772_s9 }
  0x13   : > { %s198_s14 = sshll.u32 %s191_s13, 4  ;;  %p1099_p13 = pnand %p850_p10, %p1071_p5  ;;  %s1103_s14 = int_to_ptr.vmem [resolvable:$true] %s198_s14 }
  0x14   : > { %s1105_s16 = scalar_lea.sflag [#allocation3], %s187_s7  ;;  %s895_s17 = scalar_lea.hbm %s1095_s12, 2048 }
  0x15   : > { %p896_p0 = scmp.ne.s32.totalorder %s1095_s12, %s895_s17  ;;  %p897_p1 = pneg %p1099_p13 }
  0x16   : > { %s900_s26 = scalar_lea.hbm %s1367_s0, 4096  ;;  %p901_p4 = scmp.lt.u32.totalorder %s1095_s12, %s1367_s0 }
  0x17   : > { %p898_p2 = pnand %p897_p1, %p896_p0  ;;  %p902_p5 = scmp.lt.u32.totalorder %s900_s26, %s895_s17 }
  0x18   : > { %p904_p8 = scmp.lt.u32.totalorder %s895_s17, %s1095_s12 }
  0x19   : > { %p899_p3 = pneg %p898_p2  ;;  %p903_p7 = por %p902_p5, %p901_p4 }
  0x1b   : > { %p905_p10 = por %p904_p8, %p903_p7 }
  0x1d   : > { %p906_p9 = pnand %p905_p10, %p899_p3 }
  0x1f   : > { %909 = shalt.err (!%p906_p9)
}
  0x20   : > { %s910_s7 = scalar_lea.vmem %s1103_s14, 2048  ;;  %s993_s9 = smov [#allocation2]  }
  0x21   : > { %p911_p0 = scmp.ne.s32.totalorder %s1103_s14, %s910_s7  ;;  %s915_s10 = sshll.u32 %s993_s9, 4  ;;  %s916_s10 = int_to_ptr.vmem [resolvable:$false] %s915_s10 }
  0x22   : > { %s917_s11 = scalar_lea.vmem %s916_s10, 4096  ;;  %p918_p11 = scmp.lt.s32.totalorder %s1103_s14, %s916_s10 }
  0x23   : > { %p913_p2 = pnand %p911_p0, %p897_p1  ;;  %p919_p4 = scmp.lt.s32.totalorder %s917_s11, %s910_s7 }
  0x25   : > { %p914_p12 = pneg %p913_p2  ;;  %p920_p5 = por %p919_p4, %p918_p11 }
  0x27   : > { %p921_p7 = pnand %p920_p5, %p914_p12 }
  0x29   : > { %924 = shalt.err (!%p921_p7)
}
  0x2a   : > { %s994_s13 = smov 256   ;;  %s995_s17 = smov 16  }
  0x2b   : > { %845 = dma.hbm_to_vmem [thread:$0]  (!%p1099_p13), %s1095_s12, 2048, %s1103_s14, %s1105_s16, %s994_s13, %s994_s13, %s995_s17  }
  0x2c   : > { %p775_p9 = scmp.ge.s32.totalorder %s991_s21, 1  ;;  %p206_p1 = scmp.lt.s32.totalorder %s991_s21, 3 }
  0x2e   : > { %p207_p3 = pnand %p775_p9, %p206_p1 }
  0x2f   : > { %s1136_s23 = sand.u32 (!%p207_p3), 1, %s983_s19  }
  0x30   : > { %210 = sbr.rel (%p207_p3) target bundleno = 845 (0x34d), region = 40  ;;  %s776_s25 = sshll.u32 (!%p207_p3), %s1136_s23, 7 }
  0x31   : > { %s213_s26 = scalar_lea.sflag (!%p207_p3), [#allocation3], %s1136_s23  ;;  %s1142_s28 = scalar_lea.vmem (!%p207_p3), [#allocation2], %s776_s25 }
  0x37   : > { %970 = dma.done.wait (%p1075_p6), %s213_s26, 2048  }
  0x38   : > { %972 = vsyncadd (%p1075_p6), %s213_s26, 4294965248  ;;  %v1149_v0 = vld [vmem:[%s1142_s28 + $0x20] sm:$0xff]  ;;  %v1152_v1 = vld [vmem:[%s1142_s28 + $0x28] sm:$0xff]  ;;  %v996_v35 = vmov 0.0|0.0   ;;  %vm997_vm0 = vmmov 0   ;;  %v998_v45 = vmov 0.0   ;;  %v323_v49 = vlaneseq }
  0x39   : > { %v1155_v2 = vld [vmem:[%s1142_s28] sm:$0xff]  ;;  %v265_v3 = vadd.f32 %v1152_v1, %v1149_v0  ;;  %v1160_v4 = vld [vmem:[%s1142_s28 + $0x8] sm:$0xff]  ;;  %v1163_v5 = vld [vmem:[%s1142_s28 + $0x30] sm:$0xff]  ;;  %v297_v16 = vmax.f32 %v1149_v0, %v1152_v1  ;;  %826 = vmatprep.subr.bf16.mxu0 %v996_v35  ;;  %818 = vmatprep.mubr.msk.f32.mxu0 %vm997_vm0, %v998_v45  ;;  %vm334_vm1 = vcmask 130112   ;;  %vm341_vm2 = vcmask 195712   ;;  %s1286_s10 = scalar_lea.vmem [#allocation5], %s776_s25 }
  0x3a   : > { %v1166_v6 = vld [vmem:[%s1142_s28 + $0x38] sm:$0xff]  ;;  %v259_v7 = vadd.f32 %v1160_v4, %v1155_v2  ;;  %v1171_v8 = vld [vmem:[%s1142_s28 + $0x10] sm:$0xff]  ;;  %v291_v13 = vmax.f32 %v1155_v2, %v1160_v4  ;;  %v1185_v14 = vld [vmem:[%s1142_s28 + $0x40] sm:$0xff]  ;;  %821 = vmatprep.subr.mxu1 %v998_v45  ;;  %823 = vmatprep.mubr.msk.f32.mxu1 %vm997_vm0, %v998_v45  ;;  %v324_v52 = vand.u32 127, %v323_v49  ;;  %v1252_v56 = vshrl.u32 %v323_v49, 7  ;;  %s790_s25 = sshll.u32 %s1053_s22, 11 }
  0x3b   : > { %v1174_v9 = vld [vmem:[%s1142_s28 + $0x18] sm:$0xff]  ;;  %266 = vadd.xlane.f32.xlu1 %v265_v3  ;;  %v268_v10 = vadd.f32 %v1166_v6, %v1163_v5  ;;  %v1188_v15 = vld [vmem:[%s1142_s28 + $0x48] sm:$0xff]  ;;  %v1195_v18 = vld [vmem:[%s1142_s28 + $0x50] sm:$0xff]  ;;  %v300_v20 = vmax.f32 %v1163_v5, %v1166_v6  ;;  %vm348_vm3 = vcmask 261312   ;;  %vm355_vm4 = vcmask 326912   ;;  %s696_s11 = sshll.u32 %s1286_s10, 4  ;;  %s1317_s26 = scalar_lea.hbm %s1372_s5, %s790_s25  ;;  %s1319_s11 = int_to_ptr.vmem [resolvable:$true] %s696_s11 }
  0x3c   : > { %260 = vadd.xlane.f32.xlu0 %v259_v7  ;;  %v262_v11 = vadd.f32 %v1174_v9, %v1171_v8  ;;  %v294_v12 = vmax.f32 %v1171_v8, %v1174_v9  ;;  %v271_v17 = vadd.f32 %v1188_v15, %v1185_v14  ;;  %v1198_v19 = vld [vmem:[%s1142_s28 + $0x58] sm:$0xff]  ;;  %v1205_v22 = vld [vmem:[%s1142_s28 + $0x60] sm:$0xff]  ;;  %v1208_v23 = vld [vmem:[%s1142_s28 + $0x68] sm:$0xff]  ;;  %v303_v24 = vmax.f32 %v1185_v14, %v1188_v15  ;;  %s683_s22 = scalar_lea.sflag [#allocation4], %s1136_s23  ;;  %p1379_p11 = scmp.ne.s32.totalorder %s1376_s30, 0 }
  0x3d   : > { %v274_v21 = vadd.f32 %v1198_v19, %v1195_v18  ;;  %v277_v25 = vadd.f32 %v1208_v23, %v1205_v22  ;;  %v1215_v26 = vld [vmem:[%s1142_s28 + $0x70] sm:$0xff]  ;;  %v1218_v27 = vld [vmem:[%s1142_s28 + $0x78] sm:$0xff]  ;;  %v306_v28 = vmax.f32 %v1195_v18, %v1198_v19  ;;  %v309_v31 = vmax.f32 %v1205_v22, %v1208_v23  ;;  %v429_v32 = vld [vmem:[%s1368_s1] sm:$0xff]  ;;  %s925_s28 = scalar_lea.vmem %s1319_s11, 2048  ;;  %s999_s29 = smov [#allocation5]  }
  0x3e   : > { %v280_v29 = vadd.f32 %v1218_v27, %v1215_v26  ;;  %v312_v30 = vmax.f32 %v1215_v26, %v1218_v27  ;;  %v430_v33 = vld [vmem:[%s1368_s1 + $0x8] sm:$0xff]  ;;  %v431_v36 = vld [vmem:[%s1368_s1 + $0x10] sm:$0xff]  ;;  %v432_v37 = vld [vmem:[%s1368_s1 + $0x18] sm:$0xff]  ;;  %v329_v54 = vadd.s32 4294967288, %v324_v52  ;;  %v336_v60 = vadd.s32 4294967280, %v324_v52  ;;  %p926_p6 = scmp.ne.s32.totalorder %s1319_s11, %s925_s28  ;;  %s929_s12 = sshll.u32 %s999_s29, 4  ;;  %s930_s12 = int_to_ptr.vmem [resolvable:$false] %s929_s12 }
  0x3f   : > { %269 = vadd.xlane.f32.xlu1 %v268_v10  ;;  %v827_v34 = vpack.c.bf16 %v430_v33, %v429_v32  ;;  %v830_v38 = vpack.c.bf16 %v432_v37, %v431_v36  ;;  %v433_v39 = vld [vmem:[%s1368_s1 + $0x20] sm:$0xff]  ;;  %v434_v40 = vld [vmem:[%s1368_s1 + $0x28] sm:$0xff]  ;;  %v435_v42 = vld [vmem:[%s1368_s1 + $0x30] sm:$0xff]  ;;  %v327_v62 = vsub.s32 %v324_v52, %v1252_v56  ;;  %v343_v3 = vadd.s32 4294967272, %v324_v52  ;;  %s931_s14 = scalar_lea.vmem %s930_s12, 4096  ;;  %p932_p8 = scmp.lt.s32.totalorder %s1319_s11, %s930_s12 }
  0x40   : > { %263 = vadd.xlane.f32.xlu0 %v262_v11  ;;  %v833_v41 = vpack.c.bf16 %v434_v40, %v433_v39  ;;  %v436_v43 = vld [vmem:[%s1368_s1 + $0x38] sm:$0xff]  ;;  %v332_v58 = vsub.s32 %v329_v54, %v1252_v56  ;;  %v350_v10 = vadd.s32 4294967264, %v324_v52  ;;  %v357_v11 = vadd.s32 4294967256, %v324_v52  ;;  %p927_p12 = pnand %p926_p6, %p1379_p11  ;;  %p933_p10 = scmp.lt.s32.totalorder %s931_s14, %s925_s28 }
  0x41   : > { %828 = vmatpush3.bf16.msra.mxu0 %v827_v34  ;;  %v836_v44 = vpack.c.bf16 %v436_v43, %v435_v42  ;;  %vm362_vm5 = vcmask 392512   ;;  %vm369_vm6 = vcmask 458112   ;;  %vm376_vm7 = vcmask 523712  }
  0x42   : > { %829 = vmatprep.subr.bf16.mxu0 %v996_v35  ;;  %v360_v32 = vsub.s32 %v357_v11, %v1252_v56  ;;  %vm427_vm8 = vcmask 1040384   ;;  %vm444_vm9 = vcmask 523264   ;;  %vm531_vm10 = vcmask 1043456   ;;  %p928_p13 = pneg %p927_p12  ;;  %p934_p0 = por %p933_p10, %p932_p8 }
  0x43   : > { %295 = vmax.xlane.f32.xlu1 %v294_v12  ;;  %vm527_vm11 = vcmask 31744  }
  0x44   : > { %292 = vmax.xlane.f32.xlu0 %v291_v13  ;;  %v339_v13 = vsub.s32 %v336_v60, %v1252_v56  ;;  %p935_p2 = pnand %p934_p0, %p928_p13 }
  0x45   : > { %831 = vmatpush3.bf16.msra.mxu0 %v830_v38 }
  0x46   : > { %832 = vmatprep.subr.bf16.mxu0 %v996_v35 }
  0x47   : > { %298 = vmax.xlane.f32.xlu1 %v297_v16 }
  0x48   : > { %272 = vadd.xlane.f32.xlu0 %v271_v17 }
  0x49   : > { %834 = vmatpush3.bf16.msra.mxu0 %v833_v41 }
  0x4a   : > { %835 = vmatprep.subr.bf16.mxu0 %v996_v35 }
  0x4b   : > { %301 = vmax.xlane.f32.xlu1 %v300_v20  ;;  %v364_v20 = vadd.s32 4294967248, %v324_v52 }
  0x4c   : > { %275 = vadd.xlane.f32.xlu0 %v274_v21 }
  0x4d   : > { %837 = vmatpush3.bf16.msra.mxu0 %v836_v44  ;;  %v367_v39 = vsub.s32 %v364_v20, %v1252_v56  ;;  %v519_v20 = vld [vmem:[%s1370_s3] sm:$0xf] }
  0x4e   : > { %822 = vmatpush3.msk.msra.mxu1 %vm531_vm10, %v519_v20 }
  0x4f   : > { %304 = vmax.xlane.f32.xlu1 %v303_v24  ;;  %v346_v24 = vsub.s32 %v343_v3, %v1252_v56 }
  0x50   : > { %278 = vadd.xlane.f32.xlu0 %v277_v25 }
  0x53   : > { %307 = vmax.xlane.f32.xlu1 %v306_v28 }
  0x54   : > { %281 = vadd.xlane.f32.xlu0 %v280_v29  ;;  %v371_v29 = vadd.s32 4294967240, %v324_v52 }
  0x56   : > { %v374_v44 = vsub.s32 %v371_v29, %v1252_v56 }
  0x57   : > { %313 = vmax.xlane.f32.xlu1 %v312_v30  ;;  %v353_v30 = vsub.s32 %v350_v10, %v1252_v56 }
  0x58   : > { %310 = vmax.xlane.f32.xlu0 %v309_v31 }
  0xc8   : > { %v267_v46 = vpop.xlane.xlu1 %266 }
  0xc9   : > { %v261_v47 = vpop.xlane.xlu0 %260  ;;  %v285_v16 = vmul.f32 0.00390625, %v267_v46 }
  0xca   : > { %v283_v63 = vmul.f32 0.00390625, %v261_v47 }
  0xcb   : > { %v340_v37 = vrot.slane %v285_v16, %v339_v13 }
  0xcc   : > { %v270_v48 = vpop.xlane.xlu1 %269  ;;  %v328_v21 = vrot.slane %v283_v63, %v327_v62 }
  0xcd   : > { %v264_v50 = vpop.xlane.xlu0 %263  ;;  %v286_v25 = vmul.f32 0.00390625, %v270_v48 }
  0xce   : > { %v284_v59 = vmul.f32 0.00390625, %v264_v50 }
  0xcf   : > { %v347_v42 = vrot.slane %v286_v25, %v346_v24 }
  0xd0   : > { %v296_v51 = vpop.xlane.xlu1 %295  ;;  %v333_v12 = vrot.slane %v284_v59, %v332_v58 }
  0xd1   : > { %v293_v53 = vpop.xlane.xlu0 %292  ;;  %v394_v34 = vrot.slane %v296_v51, %v332_v58 }
  0xd2   : > { %v335_v33 = vsel %vm334_vm1, %v333_v12, %v328_v21  ;;  %v390_v35 = vrot.slane %v293_v53, %v327_v62  ;;  %v778_v21 = vld [vmem:[%s1369_s2] ss:$0 sm:$0xff] }
  0xd3   : > { %v342_v46 = vsel %vm341_vm2, %v340_v37, %v335_v33 }
  0xd4   : > { %v299_v55 = vpop.xlane.xlu1 %298  ;;  %v395_v50 = vsel %vm334_vm1, %v394_v34, %v390_v35 }
  0xd5   : > { %v273_v57 = vpop.xlane.xlu0 %272  ;;  %v399_v38 = vrot.slane %v299_v55, %v339_v13 }
  0xd6   : > { %v287_v31 = vmul.f32 0.00390625, %v273_v57  ;;  %v349_v57 = vsel %vm348_vm3, %v347_v42, %v342_v46 }
  0xd7   : > { %v400_v53 = vsel %vm341_vm2, %v399_v38, %v395_v50 }
  0xd8   : > { %v302_v61 = vpop.xlane.xlu1 %301  ;;  %v354_v47 = vrot.slane %v287_v31, %v353_v30 }
  0xd9   : > { %v276_v7 = vpop.xlane.xlu0 %275  ;;  %v404_v43 = vrot.slane %v302_v61, %v346_v24 }
  0xda   : > { %v288_v36 = vmul.f32 0.00390625, %v276_v7  ;;  %v356_v62 = vsel %vm355_vm4, %v354_v47, %v349_v57 }
  0xdb   : > { %v405_v58 = vsel %vm348_vm3, %v404_v43, %v400_v53 }
  0xdc   : > { %v305_v17 = vpop.xlane.xlu1 %304  ;;  %v361_v51 = vrot.slane %v288_v36, %v360_v32 }
  0xdd   : > { %v279_v28 = vpop.xlane.xlu0 %278  ;;  %v409_v48 = vrot.slane %v305_v17, %v353_v30  ;;  %v780_v30 = vld [vmem:[%s1371_s4] ss:$0 sm:$0xff] }
  0xde   : > { %v289_v40 = vmul.f32 0.00390625, %v279_v28  ;;  %v363_v7 = vsel %vm362_vm5, %v361_v51, %v356_v62 }
  0xdf   : > { %v410_v63 = vsel %vm355_vm4, %v409_v48, %v405_v58 }
  0xe0   : > { %v308_v41 = vpop.xlane.xlu1 %307  ;;  %v368_v54 = vrot.slane %v289_v40, %v367_v39 }
  0xe1   : > { %v282_v45 = vpop.xlane.xlu0 %281  ;;  %v414_v52 = vrot.slane %v308_v41, %v360_v32 }
  0xe2   : > { %v290_v49 = vmul.f32 0.00390625, %v282_v45  ;;  %v370_v11 = vsel %vm369_vm6, %v368_v54, %v363_v7 }
  0xe3   : > { %v415_v10 = vsel %vm362_vm5, %v414_v52, %v410_v63 }
  0xe4   : > { %v314_v55 = vpop.xlane.xlu1 %313  ;;  %v375_v59 = vrot.slane %v290_v49, %v374_v44 }
  0xe5   : > { %v311_v60 = vpop.xlane.xlu0 %310  ;;  %v424_v61 = vrot.slane %v314_v55, %v374_v44 }
  0xe6   : > { %v419_v3 = vrot.slane %v311_v60, %v367_v39  ;;  %v377_v16 = vsel %vm376_vm7, %v375_v59, %v370_v11  ;;  %v617_v39 = vsub.s32 0, %v1252_v56 }
  0xe8   : > { %v420_v12 = vsel %vm369_vm6, %v419_v3, %v415_v10 }
  0xe9   : > { %v425_v13 = vsel %vm376_vm7, %v424_v61, %v420_v12 }
  0xea   : > { %v428_v17 = vsel %vm427_vm8, %v377_v16, %v425_v13 }
  0xeb   : > { %819 = vmatmul.mubr.msk.f32.vlgmr.msra.gmra.mrb[0].mxu0 %vm444_vm9, %v428_v17 }
 0x1be   : > { %v514_v24 = vpop.f32.mrb[0].mxu0 }
 0x1bf   : > { %v515_v25 = vadd.f32 %v778_v21, %v514_v24  ;;  %v820_v28 = vpop.f32.mrb[1].mxu0 }
 0x1c1   : > { %v518_v29 = vmax.f32 %v515_v25, 0.0 }
 0x1c3   : > { %824 = vmatmul.mubr.msk.f32.vlgmr.msra.gmra.mrb[0].mxu1 %vm527_vm11, %v518_v29 }
 0x296   : > { %v601_v31 = vpop.f32.mrb[0].mxu1 }
 0x297   : > { %v602_v32 = vadd.f32 %v780_v30, %v601_v31  ;;  %v825_v33 = vpop.f32.mrb[1].mxu1 }
 0x299   : > { %v606_v34 = vrot.slane %v602_v32, 1 }
 0x29b   : > { %v608_v35 = vadd.f32 %v606_v34, %v602_v32 }
 0x29d   : > { %v783_v36 = vmul.f32 -1.442695, %v608_v35 }
 0x29f   : > { %891 = vpow2.f32 %v783_v36 }
 0x2a9   : > { %v892_v37 = vpop.eup %891 }
 0x2aa   : > { %v612_v38 = vadd.f32 1.0, %v892_v37 }
 0x2ac   : > { %893 = vrcp.f32 %v612_v38 }
 0x2b6   : > { %v894_v40 = vpop.eup %893 }
 0x2b7   : > { %v618_v41 = vrot.slane %v894_v40, %v617_v39 }
 0x2b9   : > { %624 = vbcast.lane.b32.xlu1 %v618_v41, 264  ;;  %620 = vbcast.lane.b32.xlu0 %v618_v41, 256 }
 0x2bd   : > { %628 = vbcast.lane.b32.xlu1 %v618_v41, 272  ;;  %636 = vbcast.lane.b32.xlu0 %v618_v41, 288 }
 0x2c1   : > { %632 = vbcast.lane.b32.xlu1 %v618_v41, 280  ;;  %644 = vbcast.lane.b32.xlu0 %v618_v41, 304 }
 0x2c5   : > { %640 = vbcast.lane.b32.xlu1 %v618_v41, 296 }
 0x2c9   : > { %648 = vbcast.lane.b32.xlu1 %v618_v41, 312 }
 0x32b   : > { %v625_v42 = vpop.permute.xlu1 %624  ;;  %v621_v43 = vpop.permute.xlu0 %620 }
 0x32c   : > { %v652_v44 = vmul.f32 %v625_v42, %v1171_v8  ;;  %v653_v45 = vmul.f32 %v625_v42, %v1174_v9  ;;  %v650_v46 = vmul.f32 %v621_v43, %v1155_v2  ;;  %v651_v56 = vmul.f32 %v621_v43, %v1160_v4 }
 0x32e   : > { %668 = vst [vmem:[%s1286_s10 + $0x10] sm:$0xff] %v652_v44  ;;  %669 = vst [vmem:[%s1286_s10 + $0x18] sm:$0xff] %v653_v45 }
 0x32f   : > { %666 = vst [vmem:[%s1286_s10] sm:$0xff] %v650_v46  ;;  %667 = vst [vmem:[%s1286_s10 + $0x8] sm:$0xff] %v651_v56  ;;  %v629_v8 = vpop.permute.xlu1 %628  ;;  %v637_v2 = vpop.permute.xlu0 %636 }
 0x330   : > { %v654_v4 = vmul.f32 %v629_v8, %v1149_v0  ;;  %v655_v9 = vmul.f32 %v629_v8, %v1152_v1  ;;  %v658_v47 = vmul.f32 %v637_v2, %v1185_v14  ;;  %v659_v48 = vmul.f32 %v637_v2, %v1188_v15 }
 0x332   : > { %670 = vst [vmem:[%s1286_s10 + $0x20] sm:$0xff] %v654_v4  ;;  %671 = vst [vmem:[%s1286_s10 + $0x28] sm:$0xff] %v655_v9 }
 0x333   : > { %674 = vst [vmem:[%s1286_s10 + $0x40] sm:$0xff] %v658_v47  ;;  %675 = vst [vmem:[%s1286_s10 + $0x48] sm:$0xff] %v659_v48  ;;  %v633_v49 = vpop.permute.xlu1 %632  ;;  %v645_v50 = vpop.permute.xlu0 %644 }
 0x334   : > { %v656_v0 = vmul.f32 %v633_v49, %v1163_v5  ;;  %v657_v51 = vmul.f32 %v633_v49, %v1166_v6  ;;  %v662_v1 = vmul.f32 %v645_v50, %v1205_v22  ;;  %v663_v14 = vmul.f32 %v645_v50, %v1208_v23 }
 0x336   : > { %672 = vst [vmem:[%s1286_s10 + $0x30] sm:$0xff] %v656_v0  ;;  %673 = vst [vmem:[%s1286_s10 + $0x38] sm:$0xff] %v657_v51 }
 0x337   : > { %678 = vst [vmem:[%s1286_s10 + $0x60] sm:$0xff] %v662_v1  ;;  %679 = vst [vmem:[%s1286_s10 + $0x68] sm:$0xff] %v663_v14  ;;  %v641_v15 = vpop.permute.xlu1 %640 }
 0x338   : > { %v660_v52 = vmul.f32 %v641_v15, %v1195_v18  ;;  %v661_v53 = vmul.f32 %v641_v15, %v1198_v19 }
 0x33a   : > { %676 = vst [vmem:[%s1286_s10 + $0x50] sm:$0xff] %v660_v52  ;;  %677 = vst [vmem:[%s1286_s10 + $0x58] sm:$0xff] %v661_v53 }
 0x33b   : > { %v649_v5 = vpop.permute.xlu1 %648 }
 0x33c   : > { %v664_v6 = vmul.f32 %v649_v5, %v1215_v26  ;;  %v665_v18 = vmul.f32 %v649_v5, %v1218_v27 }
 0x33e   : > { %680 = vst [vmem:[%s1286_s10 + $0x70] sm:$0xff] %v664_v6  ;;  %681 = vst [vmem:[%s1286_s10 + $0x78] sm:$0xff] %v665_v18 }
 0x33f   : > { %938 = shalt.err (!%p935_p2)
}
 0x340   : > { %s939_s15 = scalar_lea.hbm %s1317_s26, 2048  ;;  %s943_s7 = scalar_lea.hbm %s1372_s5, 4096 }
 0x341   : > { %p940_p4 = scmp.ne.s32.totalorder %s1317_s26, %s939_s15  ;;  %p944_p9 = scmp.lt.u32.totalorder %s1317_s26, %s1372_s5 }
 0x342   : > { %p945_p1 = scmp.lt.u32.totalorder %s943_s7, %s939_s15  ;;  %p947_p6 = scmp.lt.u32.totalorder %s939_s15, %s1317_s26 }
 0x343   : > { %p941_p5 = pnand %p940_p4, %p1379_p11 }
 0x344   : > { %p946_p3 = por %p945_p1, %p944_p9 }
 0x345   : > { %p942_p7 = pneg %p941_p5 }
 0x346   : > { %p948_p12 = por %p947_p6, %p946_p3 }
 0x348   : > { %p949_p13 = pnand %p948_p12, %p942_p7 }
 0x34a   : > { %952 = shalt.err (!%p949_p13)
}
 0x34b   : > { %s1000_s25 = smov 256   ;;  %s1001_s13 = smov 16  }
 0x34c   : > { %840 = dma.vmem_to_hbm [thread:$0]  (%p1379_p11), %s1319_s11, 2048, %s1317_s26, %s683_s22, %s1000_s25, %s1000_s25, %s1001_s13  }
 0x34d PF: > { %s711_s17 = sand.u32 1, %s979_s18   ;;  %p1380_p8 = scmp.ne.s32.totalorder %s1377_s6, 0 }
 0x34e   : > { %p1381_p10 = scmp.ge.s32.totalorder %s991_s21, 2  ;;  %s712_s28 = scalar_lea.sflag [#allocation4], %s711_s17 }
 0x350   : > { %p847_p0 = pnand %p1381_p10, %p1380_p8 }
 0x352   : > { %974 = dma.done.wait (!%p847_p0), %s712_s28, 2048  }
 0x353   : > { %976 = vsyncadd (!%p847_p0), %s712_s28, 4294965248  ;;  %p18_p2 = scmp.ge.s32.totalorder %s1057_s24, 4   ;;  %s1382_s18 = smov %s983_s19 }
 0x354   : > { %s1383_s19 = smov %s987_s20  ;;  %s1384_s20 = smov %s1069_s27 }
 0x355   : > { %s1385_s21 = smov %s1057_s24  ;;  %20 = sbr.rel (!%p18_p2) target bundleno = 5 (0x5), region = 85 }
 0x35c   :  { %717 = vsyncpa [#allocation3], 1 }
 0x35d   :  { %719 = vsyncpa [#allocation3 + $0x1], 1 }
 0x35e   :  { %720 = vsyncpa [#allocation4], 1 }
 0x35f   :  { %722 = vsyncpa [#allocation4 + $0x1], 1 }

</bundles_post_ra>
